<compile_context>
chip_gen: v6e
topology: v6e:2x2x1
jax: 0.10.0
libtpu: 0.0.40
codegen_flags: <defaults>
</compile_context>

<pallas_src>
import jax
import jax.numpy as jnp
from jax.experimental import pallas as pl
from jax.experimental.pallas import tpu as pltpu


def _round_up(x, m):
    return ((x + m - 1) // m) * m


def _bf16_epilogue_ok():
    """bf16 elementwise epilogue only on chips with a bf16 VALU (v6e / v7x)."""
    try:
        kind = jax.devices()[0].device_kind.lower()
    except Exception:
        return False
    return ("v6" in kind) or ("v7" in kind)


def _make_mlp_kernel(bf16_epilogue):
    ep = jnp.bfloat16 if bf16_epilogue else jnp.float32

    def kernel(x_ref,
               w1_ref, c1_ref,
               w2_ref, c2_ref,
               w3_ref, c3_ref,
               wo_ref, bo_ref,
               o_ref):
        """One batch tile: 4 MXU matmuls (bf16 in, f32 acc); bias+ReLU epilogue in
        bf16 on v6e/v7x, f32 on v5e."""
        # fc1 (+ folded bn1) -> relu
        x = x_ref[...].astype(jnp.bfloat16)
        h = jnp.dot(x, w1_ref[...], preferred_element_type=jnp.float32)
        h = jnp.maximum(h.astype(ep) + c1_ref[...], 0).astype(jnp.bfloat16)
        # fc2 (+ folded bn2) -> relu
        h = jnp.dot(h, w2_ref[...], preferred_element_type=jnp.float32)
        h = jnp.maximum(h.astype(ep) + c2_ref[...], 0).astype(jnp.bfloat16)
        # fc3 (+ folded bn3) -> relu  (stays at its true 64-wide shape)
        h = jnp.dot(h, w3_ref[...], preferred_element_type=jnp.float32)
        h = jnp.maximum(h.astype(ep) + c3_ref[...], 0).astype(jnp.bfloat16)
        # output linear (f32 accumulate, f32 bias, unpadded-class f32 store)
        out = jnp.dot(h, wo_ref[...], preferred_element_type=jnp.float32)
        o_ref[...] = (out + bo_ref[...]).astype(o_ref.dtype)

    return kernel


def _prepare_params(params, bf16_epilogue):
    """Fold BN into the linears, cast matmul weights to bf16 (no padding)."""
    (w1, b1, s1, t1, w2, b2, s2, t2, w3, b3, s3, t3, wo, bo) = params

    def fold(w, b, s, t):
        return w * s, b * s + t

    w1f, c1 = fold(w1, b1, s1, t1)
    w2f, c2 = fold(w2, b2, s2, t2)
    w3f, c3 = fold(w3, b3, s3, t3)

    ep = jnp.bfloat16 if bf16_epilogue else jnp.float32
    bf16 = jnp.bfloat16
    return (w1f.astype(bf16), c1.astype(ep),
            w2f.astype(bf16), c2.astype(ep),
            w3f.astype(bf16), c3.astype(ep),
            wo.astype(bf16), bo.astype(jnp.float32))


@jax.jit
def simple_nn_forward(x, params):
    B, input_size = x.shape
    num_classes = params[-1].shape[1]

    bf16_epilogue = _bf16_epilogue_ok()
    (w1, c1, w2, c2, w3, c3, wo, bo) = _prepare_params(params, bf16_epilogue)

    # Batch tiling: round to the bf16 sublane pack (16) only; cap at 1024 rows
    # for very large batches (512 otherwise); keep >= 2 grid steps whenever the
    # batch allows it so v7x's two TensorCores both get work.
    b16 = _round_up(B, 16)
    cap = 1024 if B >= 4096 else 512
    tile_b = min(cap, b16)
    if b16 >= 32:
        tile_b = min(tile_b, _round_up(b16 // 2, 16))
    b_pad = _round_up(B, tile_b)
    grid = (b_pad // tile_b,)

    # Pad only the batch dim (and only if needed); features stay at the true
    # input_size and x stays f32 -> the bf16 cast happens inside the kernel,
    # so no extra HBM materialization pass over x.
    xp = x if b_pad == B else jnp.pad(x, ((0, b_pad - B), (0, 0)))

    def batch_spec(cols):
        return pl.BlockSpec((tile_b, cols), lambda i: (i, 0))

    def resident(a):  # constant index_map -> stays in VMEM across grid steps
        return pl.BlockSpec(a.shape, lambda i: (0, 0))

    flops = 2 * b_pad * (input_size * w1.shape[1]
                         + w2.shape[0] * w2.shape[1]
                         + w3.shape[0] * w3.shape[1]
                         + wo.shape[0] * num_classes)
    bytes_accessed = (xp.size * xp.dtype.itemsize
                      + sum(a.size * a.dtype.itemsize
                            for a in (w1, c1, w2, c2, w3, c3, wo, bo))
                      + b_pad * num_classes * 4)

    out = pl.pallas_call(
        _make_mlp_kernel(bf16_epilogue),
        out_shape=jax.ShapeDtypeStruct((b_pad, num_classes), jnp.float32),
        grid=grid,
        in_specs=[batch_spec(input_size),
                  resident(w1), resident(c1),
                  resident(w2), resident(c2),
                  resident(w3), resident(c3),
                  resident(wo), resident(bo)],
        out_specs=batch_spec(num_classes),
        compiler_params=pltpu.CompilerParams(
            dimension_semantics=("parallel",)),
        cost_estimate=pl.CostEstimate(
            flops=flops, transcendentals=0, bytes_accessed=bytes_accessed),
    )(xp, w1, c1, w2, c2, w3, c3, wo, bo)

    return out[:B] if b_pad != B else out


def init_params(key, input_size, num_classes, eps=1e-5):
    """Deterministic synthetic parameters matching SimpleNN's shapes (BN pre-folded
    into per-feature scale/shift for eval mode)."""
    dims = [input_size, 256, 128, 64]
    keys = jax.random.split(key, 6 * 3 + 2)
    params = []
    ki = 0
    for li in range(3):
        fan_in, fan_out = dims[li], dims[li + 1]
        w = jax.random.normal(keys[ki], (fan_in, fan_out), jnp.float32) * 0.05
        b = jax.random.normal(keys[ki + 1], (1, fan_out), jnp.float32) * 0.01
        gamma = 1.0 + 0.1 * jax.random.normal(keys[ki + 2], (1, fan_out), jnp.float32)
        beta = 0.1 * jax.random.normal(keys[ki + 3], (1, fan_out), jnp.float32)
        running_mean = 0.05 * jax.random.normal(keys[ki + 4], (1, fan_out), jnp.float32)
        running_var = jnp.abs(
            1.0 + 0.1 * jax.random.normal(keys[ki + 5], (1, fan_out), jnp.float32))
        scale = gamma / jnp.sqrt(running_var + eps)
        shift = beta - running_mean * scale
        params += [w, b, scale, shift]
        ki += 6
    wo = jax.random.normal(keys[ki], (dims[3], num_classes), jnp.float32) * 0.05
    bo = jax.random.normal(keys[ki + 1], (1, num_classes), jnp.float32) * 0.01
    params += [wo, bo]
    return tuple(params)


def reference_forward(x, params):
    """Pure-JAX f32 reference of the same eval-mode forward pass."""
    (w1, b1, s1, t1, w2, b2, s2, t2, w3, b3, s3, t3, wo, bo) = params
    h = jnp.maximum((x @ w1 + b1) * s1 + t1, 0.0)
    h = jnp.maximum((h @ w2 + b2) * s2 + t2, 0.0)
    h = jnp.maximum((h @ w3 + b3) * s3 + t3, 0.0)
    return h @ wo + bo


if __name__ == "__main__":
    key = jax.random.PRNGKey(0)
    k_x, k_p = jax.random.split(key)

    batch = 8
    input_size = 32
    num_classes = 8

    x = jax.random.normal(k_x, (batch, input_size), jnp.float32)
    params = init_params(k_p, input_size, num_classes)

    out = simple_nn_forward(x, params)
    out = jax.block_until_ready(out)

    ref = reference_forward(x, params)
    assert out.shape == (batch, num_classes)
    # bf16 matmul operands (f32 accumulation) -> looser tolerance than pure f32.
    assert jnp.allclose(out, ref, atol=1e-2, rtol=1e-2), (
        "mismatch vs reference: max abs diff = %g" % float(jnp.max(jnp.abs(out - ref))))

    print("KERNEL_OK")
</pallas_src>

<mosaic_0001>
module attributes {stable_mosaic.version = 11 : i64} {
  func.func @kernel(%arg0: i32, %arg1: memref<16x32xf32, #tpu.memory_space<vmem>>, %arg2: memref<32x256xbf16, #tpu.memory_space<vmem>>, %arg3: memref<1x256xf32, #tpu.memory_space<vmem>>, %arg4: memref<256x128xbf16, #tpu.memory_space<vmem>>, %arg5: memref<1x128xf32, #tpu.memory_space<vmem>>, %arg6: memref<128x64xbf16, #tpu.memory_space<vmem>>, %arg7: memref<1x64xf32, #tpu.memory_space<vmem>>, %arg8: memref<64x8xbf16, #tpu.memory_space<vmem>>, %arg9: memref<1x8xf32, #tpu.memory_space<vmem>>, %arg10: memref<16x8xf32, #tpu.memory_space<vmem>>) attributes {dimension_semantics = [#tpu.dimension_semantics<parallel>], iteration_bounds = array<i64: 1>, scalar_prefetch = 0 : i64, scratch_operands = 0 : i64, tpu.core_type = #tpu.core_type<tc>, window_params = [{transform_indices = @transform_0, window_bounds = array<i64: 16, 32>}, {pipeline_mode = #tpu.pipeline_mode<synchronous>, transform_indices = @transform_1, window_bounds = array<i64: 32, 256>}, {pipeline_mode = #tpu.pipeline_mode<synchronous>, transform_indices = @transform_2, window_bounds = array<i64: 1, 256>}, {pipeline_mode = #tpu.pipeline_mode<synchronous>, transform_indices = @transform_3, window_bounds = array<i64: 256, 128>}, {pipeline_mode = #tpu.pipeline_mode<synchronous>, transform_indices = @transform_4, window_bounds = array<i64: 1, 128>}, {pipeline_mode = #tpu.pipeline_mode<synchronous>, transform_indices = @transform_5, window_bounds = array<i64: 128, 64>}, {pipeline_mode = #tpu.pipeline_mode<synchronous>, transform_indices = @transform_6, window_bounds = array<i64: 1, 64>}, {pipeline_mode = #tpu.pipeline_mode<synchronous>, transform_indices = @transform_7, window_bounds = array<i64: 64, 8>}, {pipeline_mode = #tpu.pipeline_mode<synchronous>, transform_indices = @transform_8, window_bounds = array<i64: 1, 8>}, {transform_indices = @transform_9, window_bounds = array<i64: 16, 8>}]} {
    %c0 = arith.constant 0 : index
    %c0_0 = arith.constant 0 : index
    %0 = vector.load %arg1[%c0, %c0_0] : memref<16x32xf32, #tpu.memory_space<vmem>>, vector<16x32xf32>
    %1 = arith.truncf %0 : vector<16x32xf32> to vector<16x32xbf16>
    %c0_1 = arith.constant 0 : index
    %c0_2 = arith.constant 0 : index
    %2 = vector.load %arg2[%c0_1, %c0_2] : memref<32x256xbf16, #tpu.memory_space<vmem>>, vector<32x256xbf16>
    %cst = arith.constant dense<0.000000e+00> : vector<16x256xf32>
    %3 = tpu.matmul %1, %2, %cst {dimension_numbers = #tpu.dot_dimension_numbers<[1], [0], [0], [1], [0, 0, 1, 1], [], []>} : vector<16x32xbf16>, vector<32x256xbf16>, vector<16x256xf32> -> vector<16x256xf32>
    %c0_3 = arith.constant 0 : index
    %c0_4 = arith.constant 0 : index
    %4 = vector.load %arg3[%c0_3, %c0_4] : memref<1x256xf32, #tpu.memory_space<vmem>>, vector<1x256xf32>
    %5 = vector.broadcast %4 : vector<1x256xf32> to vector<16x256xf32>
    %6 = arith.addf %3, %5 : vector<16x256xf32>
    %cst_5 = arith.constant 0.000000e+00 : f32
    %7 = vector.broadcast %cst_5 : f32 to vector<16x256xf32>
    %8 = arith.maximumf %6, %7 : vector<16x256xf32>
    %9 = arith.truncf %8 : vector<16x256xf32> to vector<16x256xbf16>
    %c0_6 = arith.constant 0 : index
    %c0_7 = arith.constant 0 : index
    %10 = vector.load %arg4[%c0_6, %c0_7] : memref<256x128xbf16, #tpu.memory_space<vmem>>, vector<256x128xbf16>
    %cst_8 = arith.constant dense<0.000000e+00> : vector<16x128xf32>
    %11 = tpu.matmul %9, %10, %cst_8 {dimension_numbers = #tpu.dot_dimension_numbers<[1], [0], [0], [1], [0, 0, 1, 1], [], []>} : vector<16x256xbf16>, vector<256x128xbf16>, vector<16x128xf32> -> vector<16x128xf32>
    %c0_9 = arith.constant 0 : index
    %c0_10 = arith.constant 0 : index
    %12 = vector.load %arg5[%c0_9, %c0_10] : memref<1x128xf32, #tpu.memory_space<vmem>>, vector<1x128xf32>
    %13 = vector.broadcast %12 : vector<1x128xf32> to vector<16x128xf32>
    %14 = arith.addf %11, %13 : vector<16x128xf32>
    %cst_11 = arith.constant 0.000000e+00 : f32
    %15 = vector.broadcast %cst_11 : f32 to vector<16x128xf32>
    %16 = arith.maximumf %14, %15 : vector<16x128xf32>
    %17 = arith.truncf %16 : vector<16x128xf32> to vector<16x128xbf16>
    %c0_12 = arith.constant 0 : index
    %c0_13 = arith.constant 0 : index
    %18 = vector.load %arg6[%c0_12, %c0_13] : memref<128x64xbf16, #tpu.memory_space<vmem>>, vector<128x64xbf16>
    %cst_14 = arith.constant dense<0.000000e+00> : vector<16x64xf32>
    %19 = tpu.matmul %17, %18, %cst_14 {dimension_numbers = #tpu.dot_dimension_numbers<[1], [0], [0], [1], [0, 0, 1, 1], [], []>} : vector<16x128xbf16>, vector<128x64xbf16>, vector<16x64xf32> -> vector<16x64xf32>
    %c0_15 = arith.constant 0 : index
    %c0_16 = arith.constant 0 : index
    %20 = vector.load %arg7[%c0_15, %c0_16] : memref<1x64xf32, #tpu.memory_space<vmem>>, vector<1x64xf32>
    %21 = vector.broadcast %20 : vector<1x64xf32> to vector<16x64xf32>
    %22 = arith.addf %19, %21 : vector<16x64xf32>
    %cst_17 = arith.constant 0.000000e+00 : f32
    %23 = vector.broadcast %cst_17 : f32 to vector<16x64xf32>
    %24 = arith.maximumf %22, %23 : vector<16x64xf32>
    %25 = arith.truncf %24 : vector<16x64xf32> to vector<16x64xbf16>
    %c0_18 = arith.constant 0 : index
    %c0_19 = arith.constant 0 : index
    %26 = vector.load %arg8[%c0_18, %c0_19] : memref<64x8xbf16, #tpu.memory_space<vmem>>, vector<64x8xbf16>
    %cst_20 = arith.constant dense<0.000000e+00> : vector<16x8xf32>
    %27 = tpu.matmul %25, %26, %cst_20 {dimension_numbers = #tpu.dot_dimension_numbers<[1], [0], [0], [1], [0, 0, 1, 1], [], []>} : vector<16x64xbf16>, vector<64x8xbf16>, vector<16x8xf32> -> vector<16x8xf32>
    %c0_21 = arith.constant 0 : index
    %c0_22 = arith.constant 0 : index
    %28 = vector.load %arg9[%c0_21, %c0_22] : memref<1x8xf32, #tpu.memory_space<vmem>>, vector<1x8xf32>
    %29 = vector.broadcast %28 : vector<1x8xf32> to vector<16x8xf32>
    %30 = arith.addf %27, %29 : vector<16x8xf32>
    %c0_23 = arith.constant 0 : index
    %c0_24 = arith.constant 0 : index
    %31 = vector.load %arg10[%c0_23, %c0_24] : memref<16x8xf32, #tpu.memory_space<vmem>>, vector<16x8xf32>
    tpu.vector_store %arg10[%c0_23, %c0_24], %30 {strides = array<i32>} : memref<16x8xf32, #tpu.memory_space<vmem>>, vector<16x8xf32>,
    return
  }
  func.func @transform_0(%arg0: i32) -> (i32, i32) {
    %c0_i32 = arith.constant 0 : i32
    %c0_i32_0 = arith.constant 0 : i32
    return %arg0, %c0_i32 : i32, i32
  }
  func.func @transform_1(%arg0: i32) -> (i32, i32) {
    %c0_i32 = arith.constant 0 : i32
    %c0_i32_0 = arith.constant 0 : i32
    %c0_i32_1 = arith.constant 0 : i32
    return %c0_i32, %c0_i32_0 : i32, i32
  }
  func.func @transform_2(%arg0: i32) -> (i32, i32) {
    %c0_i32 = arith.constant 0 : i32
    %c0_i32_0 = arith.constant 0 : i32
    %c0_i32_1 = arith.constant 0 : i32
    return %c0_i32, %c0_i32_0 : i32, i32
  }
  func.func @transform_3(%arg0: i32) -> (i32, i32) {
    %c0_i32 = arith.constant 0 : i32
    %c0_i32_0 = arith.constant 0 : i32
    %c0_i32_1 = arith.constant 0 : i32
    return %c0_i32, %c0_i32_0 : i32, i32
  }
  func.func @transform_4(%arg0: i32) -> (i32, i32) {
    %c0_i32 = arith.constant 0 : i32
    %c0_i32_0 = arith.constant 0 : i32
    %c0_i32_1 = arith.constant 0 : i32
    return %c0_i32, %c0_i32_0 : i32, i32
  }
  func.func @transform_5(%arg0: i32) -> (i32, i32) {
    %c0_i32 = arith.constant 0 : i32
    %c0_i32_0 = arith.constant 0 : i32
    %c0_i32_1 = arith.constant 0 : i32
    return %c0_i32, %c0_i32_0 : i32, i32
  }
  func.func @transform_6(%arg0: i32) -> (i32, i32) {
    %c0_i32 = arith.constant 0 : i32
    %c0_i32_0 = arith.constant 0 : i32
    %c0_i32_1 = arith.constant 0 : i32
    return %c0_i32, %c0_i32_0 : i32, i32
  }
  func.func @transform_7(%arg0: i32) -> (i32, i32) {
    %c0_i32 = arith.constant 0 : i32
    %c0_i32_0 = arith.constant 0 : i32
    %c0_i32_1 = arith.constant 0 : i32
    return %c0_i32, %c0_i32_0 : i32, i32
  }
  func.func @transform_8(%arg0: i32) -> (i32, i32) {
    %c0_i32 = arith.constant 0 : i32
    %c0_i32_0 = arith.constant 0 : i32
    %c0_i32_1 = arith.constant 0 : i32
    return %c0_i32, %c0_i32_0 : i32, i32
  }
  func.func @transform_9(%arg0: i32) -> (i32, i32) {
    %c0_i32 = arith.constant 0 : i32
    %c0_i32_0 = arith.constant 0 : i32
    return %arg0, %c0_i32 : i32, i32
  }
}

</mosaic_0001>

<bundles_post_ra>
// kernel: simple_nn_forward.1
= control target key start
LH: loop header
LB: loop body
LE: loop exit
PB: predicated region body
PF: predicated region fallthrough
CT: control target
= control target key end

     0   :  { %v652_v1 = vmov 0   ;;  %vm72_vm0 = vcmask 261120   ;;  %v653_v24 = vmov 0.0   ;;  %v42_v29 = vlaneseq  ;;  %s839_s1 = inlined_call_operand.vmem [shape: bf16[32,256], index: 1, kind: input, shape index: {}]   ;;  %s840_s0 = inlined_call_operand.vmem [shape: f32[16,32], index: 0, kind: input, shape index: {}]   ;;  %s841_s3 = inlined_call_operand.vmem [shape: bf16[256,128], index: 3, kind: input, shape index: {}]   ;;  %s842_s5 = inlined_call_operand.vmem [shape: bf16[128,64], index: 5, kind: input, shape index: {}]   ;;  %s843_s2 = inlined_call_operand.vmem [shape: f32[1,256], index: 2, kind: input, shape index: {}]   ;;  %s844_s7 = inlined_call_operand.vmem [shape: bf16[64,8], index: 7, kind: input, shape index: {}]   ;;  %s845_s4 = inlined_call_operand.vmem [shape: f32[1,128], index: 4, kind: input, shape index: {}]   ;;  %s846_s6 = inlined_call_operand.vmem [shape: f32[1,64], index: 6, kind: input, shape index: {}]   ;;  %s847_s8 = inlined_call_operand.vmem [shape: f32[1,8], index: 8, kind: input, shape index: {}]   ;;  %s848_s9 = inlined_call_operand.vmem [shape: f32[16,8], index: 9, kind: output, shape index: {}]  }
   0x1   :  { %v618_v0 = vld [vmem:[%s839_s1 + $0x14] ss:$8 sps:$4 sm:$0xff]   ;;  %108 = vmatprep.mubr.bf16.mxu0 %v652_v1  ;;  %v620_v2 = vld [vmem:[%s839_s1 + $0x10] ss:$8 sps:$4 sm:$0xff]   ;;  %v621_v3 = vld [vmem:[%s839_s1 + $0x4] ss:$8 sps:$4 sm:$0xff]  }
   0x2   :  { %88 = vmatprep.subr.bf16.mxu0 %v618_v0  ;;  %v623_v4 = vld [vmem:[%s839_s1] ss:$8 sps:$4 sm:$0xff]   ;;  %v624_v7 = vld [vmem:[%s841_s3 + $0x78] sm:$0xff]   ;;  %v626_v10 = vld [vmem:[%s841_s3 + $0x70] sm:$0xff]   ;;  %v43_v30 = vshrl.u32 %v42_v29, 7  ;;  %vm654_vm1 = vmmov 0  }
   0x3   :  { %v33_v5 = vld [vmem:[%s840_s0] sm:$0xff]  ;;  %89 = vmatpush1.bf16.msra.mxu0 %v620_v2  ;;  %v34_v6 = vld [vmem:[%s840_s0 + $0x8] sm:$0xff]  ;;  %v625_v8 = vld [vmem:[%s841_s3 + $0x38] sm:$0xff]   ;;  %547 = vmatprep.subr.bf16.mxu1 %v624_v7  ;;  %vm458_vm2 = vcmask 523264   ;;  %vm503_vm3 = vcmask 64512  }
   0x4   :  { %90 = vmatprep.subr.bf16.mxu0 %v621_v3  ;;  %v35_v9 = vpack.c.bf16 %v34_v6, %v33_v5  ;;  %548 = vmatpush3.bf16.msra.mxu1 %v625_v8  ;;  %v627_v11 = vld [vmem:[%s841_s3 + $0x30] sm:$0xff]   ;;  %v628_v12 = vld [vmem:[%s841_s3 + $0x68] sm:$0xff]   ;;  %v630_v14 = vld [vmem:[%s841_s3 + $0x60] sm:$0xff]   ;;  %v48_v31 = vsub.s32 1, %v43_v30  ;;  %v44_v32 = vsub.s32 0, %v43_v30 }
   0x5   :  { %549 = vmatprep.subr.bf16.mxu1 %v626_v10  ;;  %v629_v13 = vld [vmem:[%s841_s3 + $0x28] sm:$0xff]   ;;  %v631_v15 = vld [vmem:[%s841_s3 + $0x20] sm:$0xff]   ;;  %v632_v16 = vld [vmem:[%s841_s3 + $0x58] sm:$0xff]  }
   0x6   :  { %v633_v17 = vld [vmem:[%s841_s3 + $0x18] sm:$0xff]   ;;  %v634_v18 = vld [vmem:[%s841_s3 + $0x50] sm:$0xff]   ;;  %v636_v20 = vld [vmem:[%s841_s3 + $0x48] sm:$0xff]  }
   0x7   :  { %91 = vmatpush1.bf16.msra.mxu0 %v623_v4  ;;  %v635_v19 = vld [vmem:[%s841_s3 + $0x10] sm:$0xff]   ;;  %v637_v21 = vld [vmem:[%s841_s3 + $0x8] sm:$0xff]   ;;  %v638_v22 = vld [vmem:[%s841_s3 + $0x40] sm:$0xff]  }
   0x8   :  { %550 = vmatpush3.bf16.msra.mxu1 %v627_v11  ;;  %v639_v23 = vld [vmem:[%s841_s3] sm:$0xff]   ;;  %583 = vmatprep.subr.bf16.mxu0 %v653_v24  ;;  %v640_v25 = vld [vmem:[%s842_s5 + $0x38] sm:$0xff]   ;;  %v641_v26 = vld [vmem:[%s842_s5 + $0x30] sm:$0xff]  }
   0x9   :  { %551 = vmatprep.subr.bf16.mxu1 %v628_v12  ;;  %v642_v27 = vld [vmem:[%s842_s5 + $0x28] sm:$0xff]   ;;  %v643_v28 = vld [vmem:[%s842_s5 + $0x20] sm:$0xff]   ;;  %v644_v50 = vld [vmem:[%s842_s5 + $0x18] sm:$0xff]  }
   0xa   :  { %514 = vmatmul.mubr.msk.bf16.vlgmr.msra.gmra.mxu0 %vm72_vm0, %v35_v9  ;;  %v40_v33 = vld [vmem:[%s843_s2] sm:$0x3]  ;;  %v645_v51 = vld [vmem:[%s842_s5 + $0x10] sm:$0xff]   ;;  %v646_v52 = vld [vmem:[%s842_s5 + $0x8] sm:$0xff]  }
   0xb   :  { %584 = vmatpush3.bf16.msra.mxu0 %v640_v25  ;;  %v49_v35 = vrot.slane %v40_v33, %v48_v31  ;;  %v45_v36 = vrot.slane %v40_v33, %v44_v32  ;;  %v647_v53 = vld [vmem:[%s842_s5] sm:$0xff]   ;;  %599 = vmatprep.mubr.msk.bf16.mxu0 %vm654_vm1, %v653_v24  ;;  %v648_v54 = vld [vmem:[%s844_s7 + $0x18] sm:$0xff]   ;;  %v649_v3 = vld [vmem:[%s844_s7 + $0x10] sm:$0xff]  }
   0xc   :  { %552 = vmatpush3.bf16.msra.mxu1 %v629_v13  ;;  %585 = vmatprep.subr.bf16.mxu0 %v653_v24  ;;  %v515_v58 = vld [vmem:[%s845_s4] ss:$0 sm:$0xff]  ;;  %v650_v4 = vld [vmem:[%s844_s7 + $0x8] sm:$0xff]  }
   0xd   :  { %553 = vmatprep.subr.bf16.mxu1 %v630_v14  ;;  %v651_v5 = vld [vmem:[%s844_s7] sm:$0xff]  }
   0xe   :  { %v532_v6 = vld [vmem:[%s846_s6] ss:$0 sm:$0xff] }
   0xf   :  { %586 = vmatpush3.bf16.msra.mxu0 %v641_v26 }
  0x10   :  { %554 = vmatpush3.bf16.msra.mxu1 %v631_v15  ;;  %587 = vmatprep.subr.bf16.mxu0 %v653_v24 }
  0x11   :  { %555 = vmatprep.subr.bf16.mxu1 %v632_v16  ;;  %v541_v16 = vld [vmem:[%s847_s8] ss:$0 sm:$0xff] }
  0x13   :  { %588 = vmatpush3.bf16.msra.mxu0 %v642_v27 }
  0x14   :  { %556 = vmatpush3.bf16.msra.mxu1 %v633_v17  ;;  %589 = vmatprep.subr.bf16.mxu0 %v653_v24 }
  0x15   :  { %557 = vmatprep.subr.bf16.mxu1 %v634_v18 }
  0x17   :  { %590 = vmatpush3.bf16.msra.mxu0 %v643_v28 }
  0x18   :  { %558 = vmatpush3.bf16.msra.mxu1 %v635_v19  ;;  %591 = vmatprep.subr.bf16.mxu0 %v653_v24 }
  0x19   :  { %559 = vmatprep.subr.bf16.mxu1 %v636_v20 }
  0x1b   :  { %592 = vmatpush3.bf16.msra.mxu0 %v644_v50 }
  0x1c   :  { %560 = vmatpush3.bf16.msra.mxu1 %v637_v21  ;;  %593 = vmatprep.subr.bf16.mxu0 %v653_v24 }
  0x1d   :  { %561 = vmatprep.subr.bf16.mxu1 %v638_v22 }
  0x1f   :  { %594 = vmatpush3.bf16.msra.mxu0 %v645_v51 }
  0x20   :  { %562 = vmatpush3.bf16.msra.mxu1 %v639_v23  ;;  %595 = vmatprep.subr.bf16.mxu0 %v653_v24 }
  0x21   :  { %603 = vmatprep.subr.bf16.mxu1 %v653_v24 }
  0x23   :  { %596 = vmatpush3.bf16.msra.mxu0 %v646_v52 }
  0x24   :  { %597 = vmatprep.subr.bf16.mxu0 %v653_v24 }
  0x27   :  { %598 = vmatpush3.bf16.msra.mxu0 %v647_v53 }
  0xca   :  { %v110_v34 = vpop.f32.mrf.mxu0 }
  0xcb   :  { %v111_v41 = vadd.f32 %v110_v34, %v45_v36 }
  0xcc   :  { %v112_v37 = vpop.f32.mrf.mxu0 }
  0xcd   :  { %v113_v39 = vadd.f32 %v112_v37, %v49_v35  ;;  %v119_v47 = vmax.f32 %v111_v41, 0.0 }
  0xce   :  { %v114_v38 = vpop.f32.mrf.mxu0 }
  0xcf   :  { %v115_v40 = vadd.f32 %v114_v38, %v45_v36  ;;  %v120_v45 = vmax.f32 %v113_v39, 0.0 }
  0xd0   :  { %v116_v42 = vpop.f32.mrf.mxu0 }
  0xd1   :  { %v117_v43 = vadd.f32 %v116_v42, %v49_v35  ;;  %v121_v44 = vmax.f32 %v115_v40, 0.0 }
  0xd3   :  { %v122_v46 = vmax.f32 %v117_v43, 0.0  ;;  %v123_v49 = vpack.c.bf16 %v121_v44, %v119_v47 }
  0xd5   :  { %v124_v48 = vpack.c.bf16 %v122_v46, %v120_v45 }
  0xd7   :  { %292 = vmatprep.mubr.bf16.mxu1 %v124_v48 }
  0xd8   :  { %293 = vmatmul.mubr.bf16.vlgmr.msra.gmra.mxu1 %v123_v49 }
  0xd9   :  { %611 = vmatprep.mubr.msk.bf16.mxu1 %vm654_vm1, %v653_v24  ;;  %604 = vmatpush3.bf16.msra.mxu1 %v648_v54 }
  0xda   :  { %605 = vmatprep.subr.bf16.mxu1 %v653_v24 }
  0xdd   :  { %606 = vmatpush3.bf16.msra.mxu1 %v649_v3 }
  0xde   :  { %607 = vmatprep.subr.bf16.mxu1 %v653_v24 }
  0xe1   :  { %608 = vmatpush3.bf16.msra.mxu1 %v650_v4 }
  0xe2   :  { %609 = vmatprep.subr.bf16.mxu1 %v653_v24 }
  0xe5   :  { %610 = vmatpush3.bf16.msra.mxu1 %v651_v5 }
 0x198   :  { %v563_v55 = vpop.f32.mrf.mxu1 }
 0x19a   :  { %v564_v56 = vpop.f32.mrf.mxu1 }
 0x19b   :  { %v565_v57 = vadd.f32 %v564_v56, %v563_v55 }
 0x19c   :  { %v566_v59 = vpop.f32.mrf.mxu1 }
 0x19d   :  { %v295_v61 = vadd.f32 %v565_v57, %v515_v58 }
 0x19e   :  { %v567_v60 = vpop.f32.mrf.mxu1 }
 0x19f   :  { %v568_v62 = vadd.f32 %v567_v60, %v566_v59  ;;  %v301_v0 = vmax.f32 %v295_v61, 0.0 }
 0x1a1   :  { %v298_v63 = vadd.f32 %v568_v62, %v515_v58 }
 0x1a3   :  { %v302_v1 = vmax.f32 %v298_v63, 0.0 }
 0x1a5   :  { %v303_v2 = vpack.c.bf16 %v302_v1, %v301_v0 }
 0x1a7   :  { %600 = vmatmul.mubr.bf16.vlgmr.msra.gmra.mxu0 %v303_v2 }
 0x267   :  { %v409_v7 = vpop.f32.mrf.mxu0 }
 0x268   :  { %v410_v9 = vadd.f32 %v532_v6, %v409_v7 }
 0x269   :  { %v601_v8 = vpop.f32.mrf.mxu0 }
 0x26a   :  { %v416_v13 = vmax.f32 %v410_v9, 0.0 }
 0x26b   :  { %v412_v10 = vpop.f32.mrf.mxu0 }
 0x26c   :  { %v413_v11 = vadd.f32 %v532_v6, %v412_v10 }
 0x26d   :  { %v602_v12 = vpop.f32.mrf.mxu0 }
 0x26e   :  { %v417_v14 = vmax.f32 %v413_v11, 0.0 }
 0x270   :  { %v418_v15 = vpack.c.bf16 %v417_v14, %v416_v13 }
 0x272   :  { %612 = vmatmul.mubr.msk.bf16.vlgmr.msra.gmra.mxu1 %vm458_vm2, %v418_v15 }
 0x332   :  { %v496_v17 = vpop.f32.mrf.mxu1 }
 0x333   :  { %v497_v18 = vadd.f32 %v541_v16, %v496_v17 }
 0x334   :  { %v613_v19 = vpop.f32.mrf.mxu1 }
 0x335   :  { %504 = vst.msk [vmem:[%s848_s9] sm:$0xff] %vm503_vm3, %v497_v18 }
 0x336   :  { %v499_v20 = vpop.f32.mrf.mxu1 }
 0x337   :  { %v500_v21 = vadd.f32 %v541_v16, %v499_v20 }
 0x338   :  { %v614_v22 = vpop.f32.mrf.mxu1 }
 0x339   :  { %505 = vst.msk [vmem:[%s848_s9 + $0x8] sm:$0xff] %vm503_vm3, %v500_v21 }

</bundles_post_ra>
